<compile_context>
chip_gen: v7x
topology: tpu7x:2x2x1
jax: 0.10.0
libtpu: 0.0.40
codegen_flags: <defaults>
</compile_context>

<pallas_src>
import jax
import jax.numpy as jnp
from jax import lax
from jax.experimental import pallas as pl
from jax.experimental.pallas import tpu as pltpu

# ----- fixed function set (deterministic stand-in for utils.functions.default_func)
N_SINGLE = 5                      # identity, square, sin, exp, sigmoid
N_DOUBLE = 1                      # product (2-input)
N_FUNCS = N_SINGLE + N_DOUBLE     # 6  -> output width
OUT_DIM = N_FUNCS + N_DOUBLE      # 7  -> width of g = x @ W
W_ROWS_PADDED = 8                 # OUT_DIM padded to one full sublane tile

# Contract the last dim of both operands: (F, K) x (TB, K) -> (F, TB).
_NT_DIMS = (((1,), (1,)), ((), ()))


def symbolic_layer_kernel(x_ref, wt_ref, o_ref):
    # g_t[f, b] = sum_k W[k, f] * x[b, k]  -- funcs on sublanes, batch on lanes.
    # K is tiny here; if in_dim ever grows >~128, cast operands to bf16 for the
    # v5e MXU (keep preferred_element_type=f32).
    g_t = lax.dot_general(wt_ref[...], x_ref[...], _NT_DIMS,
                          preferred_element_type=jnp.float32)   # (8, TB) f32

    # Per-function activations: each touches only its own (1, TB) row and is
    # stored directly into its disjoint output row (lane-dense stores).
    dt = o_ref.dtype
    o_ref[0:1, :] = g_t[0:1, :].astype(dt)                        # identity
    sq = g_t[1:2, :]
    o_ref[1:2, :] = (sq * sq).astype(dt)                          # square
    o_ref[2:3, :] = jnp.sin(g_t[2:3, :]).astype(dt)               # sin
    o_ref[3:4, :] = jnp.exp(g_t[3:4, :]).astype(dt)               # exp
    o_ref[4:5, :] = (1.0 / (1.0 + jnp.exp(-g_t[4:5, :]))).astype(dt)  # exact sigmoid
    o_ref[5:6, :] = (g_t[5:6, :] * g_t[6:7, :]).astype(dt)        # product (2-input)


def _round_up(a, m):
    return (a + m - 1) // m * m


def _tpu_vmem_capacity_bytes():
    """Physical VMEM per TensorCore; conservative fallback if the query fails."""
    try:
        cap = int(getattr(pltpu.get_tpu_info(), "vmem_capacity_bytes", 0))
        if cap > 0:
            return cap
    except Exception:
        pass
    return 64 * 1024 * 1024   # v7x per-TC physical (most conservative)


def _choose_tile(batch, in_dim, itemsize, max_tile, vmem_budget):
    """Pick a batch tile (multiple of 128) and cdiv grid size.

    VMEM accounting per tile-row (the x last dim is lane-padded to 128 in VMEM):
      2 x double-buffered x block + 2 x sublane-padded output block + f32 g_t.
    """
    lane_k = _round_up(in_dim, 128)
    bytes_per_row = (2 * lane_k * itemsize            # x blocks (double-buffered)
                     + 2 * W_ROWS_PADDED * itemsize   # output blocks (double-buffered)
                     + W_ROWS_PADDED * 4)             # g_t f32 temporary
    rows_cap = max(128, (vmem_budget // bytes_per_row) // 128 * 128)

    # Target ~4 MiB lane-padded x block per grid step (>=1024 rows) so the
    # fixed ~0.35 us per-step overhead is negligible vs the DMA.
    target = _round_up(max(1, (4 * 1024 * 1024) // (lane_k * itemsize)), 128)
    tile = min(max(1024, target), rows_cap)
    if max_tile is not None:
        tile = min(tile, max(128, (max_tile // 128) * 128))
    tile = min(tile, _round_up(batch, 128))

    grid = pl.cdiv(batch, tile)
    # v7x megacore: for big batches keep an even grid with >= 2 steps per core.
    if batch >= 8 * 1024:
        if grid < 4:
            tile = max(1024, _round_up(-(-batch // 4), 128))
        elif grid % 2:
            tile = max(1024, _round_up(-(-batch // (grid + 1)), 128))
        tile = min(tile, rows_cap)
        grid = pl.cdiv(batch, tile)
    return tile, grid, bytes_per_row


def symbolic_layer(x, w, *, max_tile=None, transpose_output=True):
    """x: (B, in_dim), w: (in_dim, OUT_DIM) -> (B, N_FUNCS) (PyTorch layout).

    Pass transpose_output=False to get the (N_FUNCS, B) slab directly and skip
    the extra HBM pass when the consumer can contract against it as-is.
    If the surrounding model tolerates bf16, feed x in bf16: the in-kernel math
    stays f32 and the dominant HBM stream halves.
    """
    B, in_dim = x.shape
    assert w.shape == (in_dim, OUT_DIM)

    cap = _tpu_vmem_capacity_bytes()
    # Generation-aware tile budget: v5e/v6e have 128 MiB physical VMEM,
    # v7x only 64 MiB per TensorCore.
    budget = (48 << 20) if cap >= (96 << 20) else (24 << 20)
    tile_b, grid_b, bytes_per_row = _choose_tile(
        B, in_dim, x.dtype.itemsize, max_tile, budget)

    lane_k = _round_up(in_dim, 128)
    footprint = tile_b * bytes_per_row + 2 * W_ROWS_PADDED * lane_k * x.dtype.itemsize
    vmem_limit = int(min(cap - (4 << 20), max(footprint + (8 << 20), 32 << 20)))

    # W is tiny: transpose + pad to a full 8-row sublane tile once in the wrapper.
    wt = jnp.zeros((W_ROWS_PADDED, in_dim), x.dtype).at[:OUT_DIM, :].set(
        w.T.astype(x.dtype))

    out_t = pl.pallas_call(
        symbolic_layer_kernel,
        out_shape=jax.ShapeDtypeStruct((N_FUNCS, B), x.dtype),
        grid_spec=pltpu.PrefetchScalarGridSpec(
            num_scalar_prefetch=0,
            grid=(grid_b,),
            in_specs=[
                # x stays in natural (B, in_dim) layout, read exactly once;
                # the ragged last block is an over-read whose tail columns are
                # discarded by the masked output store.
                pl.BlockSpec((tile_b, in_dim), lambda i: (i, 0)),
                # W^T is fetched once and stays VMEM-resident across the grid.
                pl.BlockSpec((W_ROWS_PADDED, in_dim), lambda i: (0, 0)),
            ],
            # Lane-dense output: funcs on sublanes, batch on the 128-wide lanes.
            out_specs=pl.BlockSpec((N_FUNCS, tile_b), lambda i: (0, i)),
        ),
        compiler_params=pltpu.CompilerParams(
            dimension_semantics=("parallel",),
            vmem_limit_bytes=vmem_limit),
    )(x, wt)

    if transpose_output:
        # Cheap layout plumbing on the small (6, B) slab only (skippable).
        return out_t.T
    return out_t


def symbolic_layer_ref(x, w):
    """Pure-JAX reference mirroring the PyTorch forward exactly."""
    g = x @ w
    outs = [
        g[:, 0],                       # identity
        g[:, 1] ** 2,                  # square
        jnp.sin(g[:, 2]),              # sin
        jnp.exp(g[:, 3]),              # exp
        jax.nn.sigmoid(g[:, 4]),       # sigmoid
        g[:, 5] * g[:, 6],             # product (2-input)
    ]
    return jnp.stack(outs, axis=1)


def _check(out, ref):
    assert jnp.allclose(out, ref, atol=1e-4, rtol=1e-4), "mismatch vs reference"


if __name__ == "__main__":
    key = jax.random.PRNGKey(0)
    kx, kw = jax.random.split(key)

    B, IN_DIM = 8, 32
    x = jax.random.normal(kx, (B, IN_DIM), dtype=jnp.float32)
    # torch.normal(mean=0.0, std=0.1, size=(in_dim, out_dim)) analogue:
    W = 0.1 * jax.random.normal(kw, (IN_DIM, OUT_DIM), dtype=jnp.float32)

    out = jax.block_until_ready(symbolic_layer(x, W))
    assert out.shape == (B, N_FUNCS)
    _check(out, symbolic_layer_ref(x, W))

    # Exercise the multi-step grid + ragged (non-multiple-of-128) batch tail.
    B2 = 300
    x2 = jax.random.normal(kx, (B2, IN_DIM), dtype=jnp.float32)
    out2 = jax.block_until_ready(symbolic_layer(x2, W, max_tile=128))
    assert out2.shape == (B2, N_FUNCS)
    _check(out2, symbolic_layer_ref(x2, W))

    # Transpose-free (funcs, batch) slab for consumers that fuse the layout.
    out2_t = jax.block_until_ready(symbolic_layer(x2, W, transpose_output=False))
    assert out2_t.shape == (N_FUNCS, B2)
    _check(out2_t.T, symbolic_layer_ref(x2, W))

    print("KERNEL_OK")
</pallas_src>

<mosaic_0001>
module attributes {stable_mosaic.version = 11 : i64} {
  func.func @symbolic_layer_kernel(%arg0: i32, %arg1: memref<128x32xf32, #tpu.memory_space<vmem>>, %arg2: memref<8x32xf32, #tpu.memory_space<vmem>>, %arg3: memref<6x128xf32, #tpu.memory_space<vmem>>) attributes {dimension_semantics = [#tpu.dimension_semantics<parallel>], iteration_bounds = array<i64: 1>, scalar_prefetch = 0 : i64, scratch_operands = 0 : i64, tpu.core_type = #tpu.core_type<tc>, window_params = [{transform_indices = @transform_0, window_bounds = array<i64: 128, 32>}, {pipeline_mode = #tpu.pipeline_mode<synchronous>, transform_indices = @transform_1, window_bounds = array<i64: 8, 32>}, {transform_indices = @transform_2, window_bounds = array<i64: 6, 128>}]} {
    %c0 = arith.constant 0 : index
    %c0_0 = arith.constant 0 : index
    %0 = vector.load %arg2[%c0, %c0_0] : memref<8x32xf32, #tpu.memory_space<vmem>>, vector<8x32xf32>
    %c0_1 = arith.constant 0 : index
    %c0_2 = arith.constant 0 : index
    %1 = vector.load %arg1[%c0_1, %c0_2] : memref<128x32xf32, #tpu.memory_space<vmem>>, vector<128x32xf32>
    %cst = arith.constant dense<0.000000e+00> : vector<8x128xf32>
    %2 = tpu.matmul %0, %1, %cst {dimension_numbers = #tpu.dot_dimension_numbers<[1], [1], [0], [0], [0, 0, 1, 0], [], []>} : vector<8x32xf32>, vector<128x32xf32>, vector<8x128xf32> -> vector<8x128xf32>
    %3 = vector.extract_strided_slice %2 {offsets = [0, 0], sizes = [1, 128], strides = [1, 1]} : vector<8x128xf32> to vector<1x128xf32>
    %c0_3 = arith.constant 0 : index
    %c0_4 = arith.constant 0 : index
    %4 = vector.load %arg3[%c0_3, %c0_4] : memref<6x128xf32, #tpu.memory_space<vmem>>, vector<1x128xf32>
    tpu.vector_store %arg3[%c0_3, %c0_4], %3 {strides = array<i32>} : memref<6x128xf32, #tpu.memory_space<vmem>>, vector<1x128xf32>,
    %5 = vector.extract_strided_slice %2 {offsets = [1, 0], sizes = [1, 128], strides = [1, 1]} : vector<8x128xf32> to vector<1x128xf32>
    %6 = arith.mulf %5, %5 : vector<1x128xf32>
    %c1 = arith.constant 1 : index
    %c0_5 = arith.constant 0 : index
    %7 = vector.load %arg3[%c1, %c0_5] : memref<6x128xf32, #tpu.memory_space<vmem>>, vector<1x128xf32>
    tpu.vector_store %arg3[%c1, %c0_5], %6 {strides = array<i32>} : memref<6x128xf32, #tpu.memory_space<vmem>>, vector<1x128xf32>,
    %8 = vector.extract_strided_slice %2 {offsets = [2, 0], sizes = [1, 128], strides = [1, 1]} : vector<8x128xf32> to vector<1x128xf32>
    %9 = math.sin %8 : vector<1x128xf32>
    %c2 = arith.constant 2 : index
    %c0_6 = arith.constant 0 : index
    %10 = vector.load %arg3[%c2, %c0_6] : memref<6x128xf32, #tpu.memory_space<vmem>>, vector<1x128xf32>
    tpu.vector_store %arg3[%c2, %c0_6], %9 {strides = array<i32>} : memref<6x128xf32, #tpu.memory_space<vmem>>, vector<1x128xf32>,
    %11 = vector.extract_strided_slice %2 {offsets = [3, 0], sizes = [1, 128], strides = [1, 1]} : vector<8x128xf32> to vector<1x128xf32>
    %12 = math.exp %11 : vector<1x128xf32>
    %c3 = arith.constant 3 : index
    %c0_7 = arith.constant 0 : index
    %13 = vector.load %arg3[%c3, %c0_7] : memref<6x128xf32, #tpu.memory_space<vmem>>, vector<1x128xf32>
    tpu.vector_store %arg3[%c3, %c0_7], %12 {strides = array<i32>} : memref<6x128xf32, #tpu.memory_space<vmem>>, vector<1x128xf32>,
    %14 = vector.extract_strided_slice %2 {offsets = [4, 0], sizes = [1, 128], strides = [1, 1]} : vector<8x128xf32> to vector<1x128xf32>
    %cst_8 = arith.constant 0.000000e+00 : f32
    %15 = vector.broadcast %cst_8 : f32 to vector<1x128xf32>
    %16 = arith.subf %15, %14 : vector<1x128xf32>
    %17 = math.exp %16 : vector<1x128xf32>
    %cst_9 = arith.constant 1.000000e+00 : f32
    %18 = vector.broadcast %cst_9 : f32 to vector<1x128xf32>
    %19 = arith.addf %18, %17 : vector<1x128xf32>
    %cst_10 = arith.constant 1.000000e+00 : f32
    %20 = vector.broadcast %cst_10 : f32 to vector<1x128xf32>
    %21 = arith.divf %20, %19 : vector<1x128xf32>
    %c4 = arith.constant 4 : index
    %c0_11 = arith.constant 0 : index
    %22 = vector.load %arg3[%c4, %c0_11] : memref<6x128xf32, #tpu.memory_space<vmem>>, vector<1x128xf32>
    tpu.vector_store %arg3[%c4, %c0_11], %21 {strides = array<i32>} : memref<6x128xf32, #tpu.memory_space<vmem>>, vector<1x128xf32>,
    %23 = vector.extract_strided_slice %2 {offsets = [5, 0], sizes = [1, 128], strides = [1, 1]} : vector<8x128xf32> to vector<1x128xf32>
    %24 = vector.extract_strided_slice %2 {offsets = [6, 0], sizes = [1, 128], strides = [1, 1]} : vector<8x128xf32> to vector<1x128xf32>
    %25 = arith.mulf %23, %24 : vector<1x128xf32>
    %c5 = arith.constant 5 : index
    %c0_12 = arith.constant 0 : index
    %26 = vector.load %arg3[%c5, %c0_12] : memref<6x128xf32, #tpu.memory_space<vmem>>, vector<1x128xf32>
    tpu.vector_store %arg3[%c5, %c0_12], %25 {strides = array<i32>} : memref<6x128xf32, #tpu.memory_space<vmem>>, vector<1x128xf32>,
    return
  }
  func.func @transform_0(%arg0: i32) -> (i32, i32) {
    %c0_i32 = arith.constant 0 : i32
    %c0_i32_0 = arith.constant 0 : i32
    return %arg0, %c0_i32 : i32, i32
  }
  func.func @transform_1(%arg0: i32) -> (i32, i32) {
    %c0_i32 = arith.constant 0 : i32
    %c0_i32_0 = arith.constant 0 : i32
    %c0_i32_1 = arith.constant 0 : i32
    return %c0_i32, %c0_i32_0 : i32, i32
  }
  func.func @transform_2(%arg0: i32) -> (i32, i32) {
    %c0_i32 = arith.constant 0 : i32
    %c0_i32_0 = arith.constant 0 : i32
    return %c0_i32, %arg0 : i32, i32
  }
}

</mosaic_0001>

<bundles_post_ra>
// kernel: tpu_custom_call.1
= control target key start
LH: loop header
LB: loop body
LE: loop exit
PB: predicated region body
PF: predicated region fallthrough
CT: control target
= control target key end

     0   :  { %7 = vsyncpa [#allocation3], 0  ;;  %s637_s0 = inlined_call_operand.hbm [shape: f32[8,32], index: 0, kind: input, shape index: {}]   ;;  %s638_s1 = inlined_call_operand.hbm [shape: f32[8,32], index: 1, kind: input, shape index: {}]   ;;  %s639_s2 = inlined_call_operand.hbm [shape: f32[6,8], index: 2, kind: output, shape index: {}]  }
   0x1   :  { %8 = vsyncpa [#allocation6], 0 }
   0x2   :  { %9 = vsyncpa [#allocation4], 0 }
   0x3   :  { %14 = vsyncadd [#allocation3], 1920  ;;  %s521_s9 = smov [#allocation2]   ;;  %s449_s13 = scalar_lea.hbm %s637_s0, 128 }
   0x4   :  { %s15_s10 = sshll.u32 %s521_s9, 4  ;;  %p450_p0 = scmp.ne.s32.totalorder %s637_s0, %s449_s13  ;;  %s16_s10 = int_to_ptr.vmem [resolvable:$true] %s15_s10 }
   0x5   :  { %p453_p1 = scmp.lt.u32.totalorder %s449_s13, %s637_s0 }
   0x7   :  { %p455_p2 = pnand %p453_p1, %p450_p0 }
   0x9   :  { %458 = shalt.err (!%p455_p2)
}
   0xa   :  { %s459_s18 = scalar_lea.vmem %s16_s10, 128  ;;  %s463_s19 = scalar_lea.vmem %s16_s10, 2048 }
   0xb   :  { %p460_p3 = scmp.ne.s32.totalorder %s16_s10, %s459_s18  ;;  %p464_p4 = scmp.lt.s32.totalorder %s16_s10, %s16_s10 }
   0xc   :  { %p465_p5 = scmp.lt.s32.totalorder %s463_s19, %s459_s18 }
   0xe   :  { %p466_p6 = por %p465_p5, %p464_p4 }
  0x10   :  { %p467_p7 = pnand %p466_p6, %p460_p3 }
  0x12   :  { %470 = shalt.err (!%p467_p7)
}
  0x13   :  { %s522_s20 = smov 128   ;;  %s523_s21 = smov 8  }
  0x14   :  { %21 = dma.hbm_to_vmem [thread:$0]  %s637_s0, 128, %s16_s10, [#allocation3], %s522_s20, %s522_s20, %s523_s21  }
  0x15   :  { %s524_s24 = smov [#allocation5]   ;;  %s471_s28 = scalar_lea.hbm %s638_s1, 128 }
  0x16   :  { %s28_s25 = sshll.u32 %s524_s24, 4  ;;  %p472_p8 = scmp.ne.s32.totalorder %s638_s1, %s471_s28  ;;  %s29_s25 = int_to_ptr.vmem [resolvable:$true] %s28_s25 }
  0x17   :  { %p475_p9 = scmp.lt.u32.totalorder %s471_s28, %s638_s1 }
  0x19   :  { %p477_p10 = pnand %p475_p9, %p472_p8 }
  0x1b   :  { %480 = shalt.err (!%p477_p10)
}
  0x1c   :  { %s481_s5 = scalar_lea.vmem %s29_s25, 128  ;;  %p486_p12 = scmp.lt.s32.totalorder %s29_s25, %s29_s25 }
  0x1d   :  { %p482_p11 = scmp.ne.s32.totalorder %s29_s25, %s481_s5  ;;  %p487_p13 = scmp.lt.s32.totalorder %s481_s5, %s481_s5 }
  0x1f   :  { %p488_p0 = por %p487_p13, %p486_p12 }
  0x21   :  { %p489_p1 = pnand %p488_p0, %p482_p11 }
  0x23   :  { %492 = shalt.err (!%p489_p1)
}
  0x24   :  { %31 = dma.hbm_to_vmem [thread:$0]  %s638_s1, 128, %s29_s25, [#allocation6]  }
  0x25   :  { %515 = dma.done.wait [#allocation3], 2048  }
  0x26   :  { %516 = vsyncadd [#allocation3], 4294965248 }
  0x27   :  { %517 = dma.done.wait [#allocation6], 128  }
  0x28   :  { %518 = vsyncadd [#allocation6], 4294967168  ;;  %v525_v0 = vmov 0.0|0.0   ;;  %vm526_vm0 = vmmov 0   ;;  %v527_v1 = vmov 0.0   ;;  %vm55_vm1 = vcmask 261120  }
  0x29   :  { %389 = vmatprep.subr.bf16.mxu0 %v525_v0  ;;  %386 = vmatprep.mubr.msk.f32.mxu0 %vm526_vm0, %v527_v1  ;;  %v39_v2 = vld [vmem:[#allocation2] sm:$0xff]  ;;  %v40_v3 = vld [vmem:[#allocation2 + $0x8] sm:$0xff]  ;;  %vm576_vm2 = vmpackc.low %vm55_vm1, %vm55_vm1  ;;  %v528_v48 = vmov 683565275   ;;  %v529_v50 = vmov 2475754826  }
  0x2a   :  { %v390_v5 = vpack.c.bf16 %v40_v3, %v39_v2  ;;  %v41_v6 = vld [vmem:[#allocation2 + $0x10] sm:$0xff]  ;;  %v42_v7 = vld [vmem:[#allocation2 + $0x18] sm:$0xff]  ;;  %v43_v9 = vld [vmem:[#allocation2 + $0x20] sm:$0xff]  ;;  %v530_v53 = vmov 2131351028   ;;  %s534_s1 = smov [#allocation7]  }
  0x2b   :  { %v394_v8 = vpack.c.bf16 %v42_v7, %v41_v6  ;;  %v44_v10 = vld [vmem:[#allocation2 + $0x28] sm:$0xff]  ;;  %v45_v12 = vld [vmem:[#allocation2 + $0x30] sm:$0xff]  ;;  %v46_v13 = vld [vmem:[#allocation2 + $0x38] sm:$0xff]  ;;  %v531_v56 = vmov 2102212464   ;;  %s306_s7 = sshll.u32 %s534_s1, 4  ;;  %s307_s7 = int_to_ptr.vmem [resolvable:$true] %s306_s7 }
  0x2c   :  { %392 = vmatpush3.bf16.xpose.msk.msra.mxu0 %vm576_vm2, %v390_v5  ;;  %v398_v11 = vpack.c.bf16 %v44_v10, %v43_v9  ;;  %v402_v14 = vpack.c.bf16 %v46_v13, %v45_v12  ;;  %v47_v15 = vld [vmem:[#allocation2 + $0x40] sm:$0xff]  ;;  %v48_v16 = vld [vmem:[#allocation2 + $0x48] sm:$0xff]  ;;  %v49_v18 = vld [vmem:[#allocation2 + $0x50] sm:$0xff]  ;;  %v532_v60 = vmov 920167782   ;;  %s493_s8 = scalar_lea.vmem %s307_s7, 128  ;;  %p498_p3 = scmp.lt.s32.totalorder %s307_s7, %s307_s7 }
  0x2d   :  { %393 = vmatprep.subr.bf16.mxu0 %v525_v0  ;;  %v406_v17 = vpack.c.bf16 %v48_v16, %v47_v15  ;;  %v50_v19 = vld [vmem:[#allocation2 + $0x58] sm:$0xff]  ;;  %v51_v21 = vld [vmem:[#allocation2 + $0x60] sm:$0xff]  ;;  %v52_v22 = vld [vmem:[#allocation2 + $0x68] sm:$0xff]  ;;  %v533_v63 = vmov 1326507024   ;;  %p494_p2 = scmp.ne.s32.totalorder %s307_s7, %s493_s8  ;;  %p499_p4 = scmp.lt.s32.totalorder %s493_s8, %s493_s8 }
  0x2e   :  { %v410_v20 = vpack.c.bf16 %v50_v19, %v49_v18  ;;  %v414_v23 = vpack.c.bf16 %v52_v22, %v51_v21  ;;  %v53_v24 = vld [vmem:[#allocation2 + $0x70] sm:$0xff]  ;;  %v54_v25 = vld [vmem:[#allocation2 + $0x78] sm:$0xff]  ;;  %v38_v27 = vld [vmem:[#allocation5] sm:$0xff] }
  0x2f   :  { %v418_v26 = vpack.c.bf16 %v54_v25, %v53_v24  ;;  %p500_p5 = por %p499_p4, %p498_p3 }
  0x31   :  { %p501_p6 = pnand %p500_p5, %p494_p2 }
  0x34   :  { %396 = vmatpush3.bf16.xpose.msk.msra.mxu0 %vm576_vm2, %v394_v8 }
  0x35   :  { %397 = vmatprep.subr.bf16.mxu0 %v525_v0 }
  0x3c   :  { %400 = vmatpush3.bf16.xpose.msk.msra.mxu0 %vm576_vm2, %v398_v11 }
  0x3d   :  { %401 = vmatprep.subr.bf16.mxu0 %v525_v0 }
  0x44   :  { %404 = vmatpush3.bf16.xpose.msk.msra.mxu0 %vm576_vm2, %v402_v14 }
  0x45   :  { %405 = vmatprep.subr.bf16.mxu0 %v525_v0 }
  0x4c   :  { %408 = vmatpush3.bf16.xpose.msk.msra.mxu0 %vm576_vm2, %v406_v17 }
  0x4d   :  { %409 = vmatprep.subr.bf16.mxu0 %v525_v0 }
  0x54   :  { %412 = vmatpush3.bf16.xpose.msk.msra.mxu0 %vm576_vm2, %v410_v20 }
  0x55   :  { %413 = vmatprep.subr.bf16.mxu0 %v525_v0 }
  0x5c   :  { %416 = vmatpush3.bf16.xpose.msk.msra.mxu0 %vm576_vm2, %v414_v23 }
  0x5d   :  { %417 = vmatprep.subr.bf16.mxu0 %v525_v0 }
  0x64   :  { %420 = vmatpush3.bf16.xpose.msk.msra.mxu0 %vm576_vm2, %v418_v26 }
  0x6b   :  { %387 = vmatmul.mubr.msk.f32.vlgmr.msra.gmra.mrb[0].mxu0 %vm55_vm1, %v38_v27 }
 0x13e   :  { %v597_v28 = vpop.f32.mrb[0].mxu0 }
 0x13f   :  { %v183_v29 = vand.u32 2139095040, %v597_v28  ;;  %177 = vst [vmem:[#allocation7] sm:$0x1] %v597_v28  ;;  %v388_v30 = vpop.f32.mrb[1].mxu0  ;;  %v178_v31 = vmul.f32 %v597_v28, %v597_v28  ;;  %v285_v32 = vmul.f32 1.442695, %v597_v28  ;;  %vm272_vm15 = vweird.f32 %v597_v28 }
 0x140   :  { %v288_v33 = vsub.f32 0.0, %v597_v28  ;;  %v296_v34 = vrot.slane %v597_v28, 1  ;;  %v180_v39 = vand.u32 2147483647, %v597_v28  ;;  %vm182_vm10 = vcmp.lt.s32.totalorder %v597_v28, 0 }
 0x141   :  { %v184_v35 = vshrl.u32 %v183_v29, 23  ;;  %179 = vst [vmem:[#allocation7] sm:$0x2] %v178_v31  ;;  %439 = vpow2.f32 %v285_v32 }
 0x142   :  { %v289_v36 = vmul.f32 1.442695, %v288_v33  ;;  %v298_v37 = vmul.f32 %v296_v34, %v597_v28  ;;  %v187_v42 = vand.u32 8388607, %v180_v39  ;;  %vm181_vm11 = vcmp.le.f32.partialorder %v180_v39, 0.7853982 }
 0x143   :  { %v333_v38 = vadd.s32 4294967169, %v184_v35 }
 0x144   :  { %441 = vpow2.f32 %v289_v36  ;;  %299 = vst [vmem:[#allocation7] sm:$0x20] %v298_v37  ;;  %v188_v47 = vor.u32 8388608, %v187_v42 }
 0x145   :  { %v190_v40 = vadd.s32 1, %v333_v38 }
 0x146   :  { %v228_v15 = vshll.u32 %v188_v47, 8 }
 0x147   :  { %vm191_vm3 = vcmp.gt.s32.totalorder %v190_v40, 0 }
 0x148   :  { %v192_v41 = vsel %vm191_vm3, %v190_v40, 0 }
 0x149   :  { %v194_v43 = vand.u32 31, %v192_v41  ;;  %v193_v46 = vshrl.u32 %v192_v41, 5 }
 0x14b   :  { %v195_v44 = vsub.s32 32, %v194_v43  ;;  %v440_v45 = vpop.eup %439  ;;  %v197_v49 = vshll.u32 %v528_v48, %v194_v43  ;;  %v200_v51 = vshll.u32 %v529_v50, %v194_v43  ;;  %v203_v55 = vshll.u32 %v530_v53, %v194_v43 }
 0x14c   :  { %287 = vst [vmem:[#allocation7] sm:$0x8] %v440_v45  ;;  %v206_v59 = vshll.u32 %v531_v56, %v194_v43  ;;  %v209_v62 = vshll.u32 %v532_v60, %v194_v43  ;;  %vm212_vm4 = vcmp.lt.s32.totalorder %v193_v46, 1  ;;  %vm215_vm5 = vcmp.lt.s32.totalorder %v193_v46, 4 }
 0x14d   :  { %v198_v52 = vshrl.u32 %v529_v50, %v195_v44  ;;  %v201_v54 = vshrl.u32 %v530_v53, %v195_v44  ;;  %v204_v57 = vshrl.u32 %v531_v56, %v195_v44  ;;  %v207_v61 = vshrl.u32 %v532_v60, %v195_v44 }
 0x14e   :  { %v442_v58 = vpop.eup %441  ;;  %v210_v0 = vshrl.u32 %v533_v63, %v195_v44  ;;  %v196_v7 = vshrl.u32 %v528_v48, %v195_v44  ;;  %vm214_vm6 = vcmp.lt.s32.totalorder %v193_v46, 3  ;;  %vm213_vm7 = vcmp.lt.s32.totalorder %v193_v46, 2 }
 0x14f   :  { %v199_v1 = vor.u32 %v198_v52, %v197_v49  ;;  %v202_v2 = vor.u32 %v201_v54, %v200_v51  ;;  %v205_v3 = vor.u32 %v204_v57, %v203_v55  ;;  %v291_v4 = vadd.f32 1.0, %v442_v58 }
 0x150   :  { %v208_v5 = vor.u32 %v207_v61, %v206_v59  ;;  %v211_v6 = vor.u32 %v210_v0, %v209_v62 }
 0x151   :  { %v217_v8 = vsel %vm215_vm5, %v205_v3, 2102212464  ;;  %v220_v9 = vsel %vm212_vm4, %v199_v1, %v202_v2  ;;  %v224_v10 = vsel %vm212_vm4, %v202_v2, %v205_v3  ;;  %443 = vrcp.f32 %v291_v4 }
 0x152   :  { %v221_v11 = vsel %vm215_vm5, %v208_v5, 920167782  ;;  %v225_v12 = vsel %vm215_vm5, %v211_v6, 1326507024  ;;  %v216_v16 = vsel %vm212_vm4, %v196_v7, %v199_v1  ;;  %v218_v17 = vsel %vm214_vm6, %v202_v2, %v217_v8 }
 0x153   :  { %v222_v13 = vsel %vm214_vm6, %v205_v3, %v221_v11  ;;  %v226_v14 = vsel %vm214_vm6, %v208_v5, %v225_v12  ;;  %v219_v24 = vsel %vm213_vm7, %v216_v16, %v218_v17 }
 0x154   :  { %v223_v18 = vsel %vm213_vm7, %v220_v9, %v222_v13  ;;  %v227_v19 = vsel %vm213_vm7, %v224_v10, %v226_v14  ;;  %v235_v26 = vmul.u32 %v228_v15, %v219_v24 }
 0x155   :  { %v610_v20 = vmul.u32.u64.low %v228_v15, %v227_v19  ;;  %v611_v21 = vmul.u32.u64.high %v228_v15, %v227_v19, %v610_v20  ;;  %v613_v22 = vmul.u32.u64.low %v228_v15, %v223_v18  ;;  %v614_v23 = vmul.u32.u64.high %v228_v15, %v223_v18, %v613_v22 }
 0x157   :  { %vm237_vm8 = vc.u32 %v611_v21, %v613_v22  ;;  %v238_v25 = vadd.s32 1, %v614_v23  ;;  %v236_v41 = vadd.s32 %v613_v22, %v611_v21 }
 0x159   :  { %v239_v27 = vsel %vm237_vm8, %v238_v25, %v614_v23 }
 0x15a   :  { %v240_v30 = vadd.s32 %v239_v27, %v235_v26 }
 0x15b   :  { %v444_v29 = vpop.eup %443 }
 0x15c   :  { %294 = vst [vmem:[#allocation7] sm:$0x10] %v444_v29  ;;  %v241_v31 = vadd.s32 536870912, %v240_v30 }
 0x15e   :  { %v242_v32 = vshrl.u32 %v241_v31, 30 }
 0x160   :  { %v243_v33 = vshll.u32 %v242_v32, 30  ;;  %v266_v53 = vsub.s32 4, %v242_v32 }
 0x162   :  { %v244_v34 = vsub.s32 %v240_v30, %v243_v33  ;;  %v267_v56 = vsel %vm182_vm10, %v266_v53, %v242_v32 }
 0x163   :  { %v269_v58 = vsel %vm181_vm11, 0, %v267_v56 }
 0x164   :  { %v246_v35 = vsub.s32 0, %v244_v34  ;;  %v273_v59 = vadd.s32 3, %v269_v58 }
 0x166   :  { %v334_v36 = vmin.u32 %v246_v35, %v244_v34  ;;  %v274_v60 = vand.u32 3, %v273_v59 }
 0x168   :  { %v248_v37 = vclz %v334_v36  ;;  %vm279_vm12 = vcmp.eq.s32.totalorder %v274_v60, 2  ;;  %vm276_vm13 = vcmp.eq.s32.totalorder %v274_v60, 0  ;;  %vm275_vm14 = vcmp.lt.s32.totalorder %v274_v60, 2 }
 0x16a   :  { %v335_v38 = vadd.s32 4294967294, %v248_v37 }
 0x16c   :  { %vm336_vm9 = vcmp.lt.s32.totalorder %v335_v38, 0 }
 0x16d   :  { %v251_v40 = vsel %vm336_vm9, 0, %v335_v38 }
 0x16e   :  { %v252_v42 = vsub.s32 32, %v251_v40  ;;  %v256_v43 = vsub.s32 4294967266, %v251_v40  ;;  %v253_v44 = vshll.u32 %v244_v34, %v251_v40 }
 0x170   :  { %v254_v45 = vshrl.u32 %v236_v41, %v252_v42  ;;  %v257_v46 = vadd.s32 127, %v256_v43 }
 0x172   :  { %v255_v47 = vor.u32 %v254_v45, %v253_v44  ;;  %v258_v48 = vshll.u32 %v257_v46, 23 }
 0x174   :  { %v259_v49 = vor.u32 4788187, %v258_v48  ;;  %v262_v51 = vcvt.s32.f32 %v255_v47 }
 0x176   :  { %v260_v50 = vand.u32 2147483647, %v259_v49 }
 0x178   :  { %v263_v52 = vmul.f32 %v262_v51, %v260_v50 }
 0x17a   :  { %v264_v54 = vxor.u32 2147483648, %v263_v52 }
 0x17c   :  { %v265_v55 = vsel %vm182_vm10, %v264_v54, %v263_v52 }
 0x17d   :  { %v268_v57 = vsel %vm181_vm11, %v597_v28, %v265_v55 }
 0x17e   :  { %445 = vcosq.f32 %v268_v57 }
 0x17f   :  { %447 = vsinq.f32 %v268_v57 }
 0x188   :  { %v446_v61 = vpop.eup %445 }
 0x189   :  { %v448_v62 = vpop.eup %447  ;;  %v280_v63 = vxor.u32 2147483648, %v446_v61 }
 0x18a   :  { %v277_v0 = vxor.u32 2147483648, %v448_v62 }
 0x18b   :  { %v281_v1 = vsel %vm279_vm12, %v280_v63, %v448_v62 }
 0x18c   :  { %v278_v39 = vsel %vm276_vm13, %v446_v61, %v277_v0 }
 0x18d   :  { %v282_v2 = vsel %vm275_vm14, %v278_v39, %v281_v1 }
 0x18e   :  { %v283_v3 = vsel %vm272_vm15, nan, %v282_v2 }
 0x18f   :  { %284 = vst [vmem:[#allocation7] sm:$0x4] %v283_v3 }
 0x190   :  { %504 = shalt.err (!%p501_p6)
}
 0x191   :  { %s505_s11 = scalar_lea.hbm %s639_s2, 128 }
 0x192   :  { %p506_p7 = scmp.ne.s32.totalorder %s639_s2, %s505_s11  ;;  %p509_p8 = scmp.lt.u32.totalorder %s505_s11, %s639_s2 }
 0x194   :  { %p511_p9 = pnand %p509_p8, %p506_p7 }
 0x196   :  { %514 = shalt.err (!%p511_p9)
}
 0x197   :  { %309 = dma.vmem_to_hbm [thread:$0]  %s307_s7, 128, %s639_s2, [#allocation4]  }
 0x198   :  { %519 = dma.done.wait [#allocation4], 128  }
 0x199   :  { %520 = vsyncadd [#allocation4], 4294967168 }
 0x19a   :  { %313 = vsyncpa [#allocation3], 1 }
 0x19b   :  { %314 = vsyncpa [#allocation6], 1 }
 0x19c   :  { %315 = vsyncpa [#allocation4], 1 }

</bundles_post_ra>
